<compile_context>
chip_gen: v6e
topology: v6e:2x2x1
jax: 0.10.0
libtpu: 0.0.40
codegen_flags: <defaults>
</compile_context>

<pallas_src>
import functools

import jax
import jax.numpy as jnp
from jax.experimental import pallas as pl
from jax.experimental.pallas import tpu as pltpu

LN_EPS = 1e-5
_MiB = 1024 * 1024


# --------------------------------------------------------------------------
# Hardware-aware sizing helpers
# --------------------------------------------------------------------------
def _hw_budgets():
    """(per-input-tile byte budget, scoped VMEM limit) per TPU generation."""
    try:
        info = pltpu.get_tpu_info()
        vmem_cap = int(getattr(info, "vmem_capacity_bytes", 0) or 0)
    except Exception:
        vmem_cap = 0
    if vmem_cap >= 100 * _MiB:
        # v5e / v6e: 128 MiB physical VMEM -> big tiles, generous scoped limit.
        return 16 * _MiB, 64 * _MiB
    if vmem_cap > 0:
        # v7x: 64 MiB per TensorCore -> 12 MiB tiles (24 MiB double-buffered).
        return 12 * _MiB, 40 * _MiB
    # Unknown backend: conservative defaults.
    return 8 * _MiB, 32 * _MiB


def _sublane(dtype):
    """Native sublane packing: 8 rows for 4-byte, 16 for 2-byte, 32 for 1-byte."""
    itemsize = jnp.dtype(dtype).itemsize
    return max(8, 32 // max(itemsize, 1))


def _aligned_divisor_of(S, cap, sub):
    """Largest d <= cap with S % d == 0 and d % sub == 0 (avoids tail masking)."""
    d = min(cap, S)
    while d >= sub:
        if S % d == 0 and d % sub == 0:
            return d
        d -= 1
    return None


def _choose_tiles(B, S, H, itemsize, budget, sub):
    """Pick (TB, TS): large tiles for bandwidth, bounded for VMEM, aligned."""
    row_bytes = max(S * H * itemsize, 1)
    tb_full = budget // row_bytes
    if tb_full >= B:
        tb = B
        # Guarantee >= 2 batch blocks when B permits so v7x megacore shards.
        if B >= 2 * sub:
            half = (B + 1) // 2
            tb = max(sub, (half // sub) * sub)
        return tb, S
    if tb_full >= sub:
        return (tb_full // sub) * sub, S
    # Rows are huge: tile the sequence axis too (running-max accumulator).
    tb = B if B < sub else sub
    ts_cap = budget // max(tb * H * itemsize, 1)
    if ts_cap >= S:
        return tb, S
    ts = _aligned_divisor_of(S, ts_cap, sub)  # prefer exact divisor -> no mask
    if ts is None:
        ts = max(sub, (ts_cap // sub) * sub)
    return tb, min(ts, S)


# --------------------------------------------------------------------------
# Kernels
# --------------------------------------------------------------------------
def _layer_norm_f32(pooled, gamma, beta, eps):
    mean = jnp.mean(pooled, axis=-1, keepdims=True)
    centered = pooled - mean
    var = jnp.mean(centered * centered, axis=-1, keepdims=True)
    inv_std = jax.lax.rsqrt(var + eps)
    return centered * inv_std * gamma.astype(jnp.float32) + beta.astype(jnp.float32)


def _pool_ln_onepass_kernel(x_ref, gamma_ref, beta_ref, o_ref, *, eps):
    # Whole (TB, S, H) slab in one tile: no scratch, no accumulator passes.
    pooled = jnp.max(x_ref[...], axis=1).astype(jnp.float32)          # (TB, H)
    out = _layer_norm_f32(pooled, gamma_ref[...], beta_ref[...], eps)
    o_ref[...] = out.astype(o_ref.dtype)


def _pool_ln_multipass_kernel(x_ref, gamma_ref, beta_ref, o_ref, max_ref, *,
                              seq_len, block_s, eps):
    # x_ref:     (TB, TS, H)  batch-rows x sequence-chunk tile
    # max_ref:   (TB, H) f32  running max (persists across the s grid axis)
    s = pl.program_id(1)
    n_s = pl.num_programs(1)

    @pl.when(s == 0)
    def _init():
        max_ref[...] = jnp.full_like(max_ref, -jnp.inf)

    def _accumulate(x):
        blk_max = jnp.max(x, axis=1).astype(jnp.float32)              # (TB, H)
        max_ref[...] = jnp.maximum(max_ref[...], blk_max)

    if seq_len % block_s != 0:
        # Only the final sequence block is partial: pay the mask there only.
        @pl.when(s < n_s - 1)
        def _full():
            _accumulate(x_ref[...])

        @pl.when(s == n_s - 1)
        def _tail():
            pos = (s * block_s
                   + jax.lax.broadcasted_iota(jnp.int32, (1, block_s, 1), 1))
            _accumulate(jnp.where(pos < seq_len, x_ref[...], -jnp.inf))
    else:
        _accumulate(x_ref[...])

    @pl.when(s == n_s - 1)
    def _finalize():
        # NOTE: padded batch-tail rows stay at -inf -> NaN after LN; they are
        # cropped at write-back so the user-visible output is unaffected.
        out = _layer_norm_f32(max_ref[...], gamma_ref[...], beta_ref[...], eps)
        o_ref[...] = out.astype(o_ref.dtype)


# --------------------------------------------------------------------------
# Wrapper
# --------------------------------------------------------------------------
def max_pooling_forward(last_hidden_state, gamma, beta,
                        hidden_states=None, attention_mask=None,
                        *, eps=LN_EPS, block_b=None, block_s=None):
    """Pallas equivalent of MaxPooling.forward.

    last_hidden_state: (B, S, H) floating-point
    gamma, beta:       (H,)      LayerNorm affine params
    hidden_states, attention_mask: accepted for signature parity, unused.
    block_b / block_s: optional tile-size overrides (testing / tuning).
    """
    # TODO(synk): integer input dtypes would need an iinfo.min sentinel instead
    # of -inf for the running max / tail mask.
    B, S, H = last_hidden_state.shape
    dtype = last_hidden_state.dtype
    itemsize = jnp.dtype(dtype).itemsize
    sub = _sublane(dtype)
    budget, vmem_limit = _hw_budgets()

    tb, ts = _choose_tiles(B, S, H, itemsize, budget, sub)
    if block_b is not None:
        tb = min(block_b, B)
        if tb != B and tb % sub != 0:
            tb = max(sub, (tb // sub) * sub)
    if block_s is not None:
        ts = min(block_s, S)
        if ts != S and ts % sub != 0:
            ts = max(sub, (ts // sub) * sub)

    gamma2 = gamma.reshape(1, H)
    beta2 = beta.reshape(1, H)

    n_b = pl.cdiv(B, tb)
    n_s = pl.cdiv(S, ts)

    cost = pl.CostEstimate(
        flops=B * S * H + 5 * B * H,
        transcendentals=B,
        bytes_accessed=(B * S * H * itemsize
                        + B * H * itemsize
                        + 2 * H * jnp.dtype(gamma.dtype).itemsize),
    )

    if n_s == 1:
        # Fast path: whole sequence per tile, single pass, no scratch.
        kernel = functools.partial(_pool_ln_onepass_kernel, eps=eps)
        grid_spec = pltpu.PrefetchScalarGridSpec(
            num_scalar_prefetch=0,
            grid=(n_b,),
            in_specs=[
                pl.BlockSpec((tb, S, H), lambda b: (b, 0, 0)),
                pl.BlockSpec((1, H), lambda b: (0, 0)),
                pl.BlockSpec((1, H), lambda b: (0, 0)),
            ],
            out_specs=pl.BlockSpec((tb, H), lambda b: (b, 0)),
        )
        semantics = ("parallel",)
    else:
        kernel = functools.partial(_pool_ln_multipass_kernel,
                                   seq_len=S, block_s=ts, eps=eps)
        grid_spec = pltpu.PrefetchScalarGridSpec(
            num_scalar_prefetch=0,
            grid=(n_b, n_s),
            in_specs=[
                pl.BlockSpec((tb, ts, H), lambda b, s: (b, s, 0)),
                pl.BlockSpec((1, H), lambda b, s: (0, 0)),
                pl.BlockSpec((1, H), lambda b, s: (0, 0)),
            ],
            out_specs=pl.BlockSpec((tb, H), lambda b, s: (b, 0)),
            scratch_shapes=[pltpu.VMEM((tb, H), jnp.float32)],
        )
        semantics = ("parallel", "arbitrary")

    return pl.pallas_call(
        kernel,
        out_shape=jax.ShapeDtypeStruct((B, H), dtype),
        grid_spec=grid_spec,
        compiler_params=pltpu.CompilerParams(
            dimension_semantics=semantics,
            vmem_limit_bytes=vmem_limit,
        ),
        cost_estimate=cost,
    )(last_hidden_state, gamma2, beta2)


# --------------------------------------------------------------------------
# Reference + tests
# --------------------------------------------------------------------------
def _reference(last_hidden_state, gamma, beta, eps=LN_EPS):
    pooled = jnp.max(last_hidden_state.astype(jnp.float32), axis=1)
    mean = jnp.mean(pooled, axis=-1, keepdims=True)
    var = jnp.mean((pooled - mean) ** 2, axis=-1, keepdims=True)
    out = (pooled - mean) * jax.lax.rsqrt(var + eps) * gamma + beta
    return out.astype(last_hidden_state.dtype)


if __name__ == "__main__":
    key = jax.random.PRNGKey(0)
    k_x, k_h, k_g, k_b, k_x2 = jax.random.split(key, 5)

    # --- Test 1: small shapes implied by the module (one-pass fast path) ---
    B, S, H = 2, 8, 128
    last_hidden_state = jax.random.normal(k_x, (B, S, H), dtype=jnp.float32)
    hidden_states = jax.random.normal(k_h, (B, S, H), dtype=jnp.float32)  # unused
    attention_mask = jnp.ones((B, S), dtype=jnp.int32)                    # unused
    gamma = 1.0 + 0.01 * jax.random.normal(k_g, (H,), dtype=jnp.float32)
    beta = 0.01 * jax.random.normal(k_b, (H,), dtype=jnp.float32)

    out = max_pooling_forward(last_hidden_state, gamma, beta,
                              hidden_states, attention_mask)
    out = jax.block_until_ready(out)
    ref = _reference(last_hidden_state, gamma, beta)
    assert out.shape == (B, H), out.shape
    assert jnp.allclose(out, ref, atol=1e-5, rtol=1e-5), \
        float(jnp.max(jnp.abs(out - ref)))

    # --- Test 2: batch tail + sequence tiling (multi-pass, masked tail) ---
    B2, S2, H2 = 10, 20, 128
    x2 = jax.random.normal(k_x2, (B2, S2, H2), dtype=jnp.float32)
    out2 = max_pooling_forward(x2, gamma, beta, block_b=8, block_s=8)
    out2 = jax.block_until_ready(out2)
    ref2 = _reference(x2, gamma, beta)
    assert out2.shape == (B2, H2), out2.shape
    assert jnp.allclose(out2, ref2, atol=1e-5, rtol=1e-5), \
        float(jnp.max(jnp.abs(out2 - ref2)))

    print("KERNEL_OK")
</pallas_src>

<mosaic_0001>
module attributes {stable_mosaic.version = 11 : i64} {
  func.func @_pool_ln_onepass_kernel(%arg0: i32, %arg1: memref<2x8x128xf32, #tpu.memory_space<vmem>>, %arg2: memref<1x128xf32, #tpu.memory_space<vmem>>, %arg3: memref<1x128xf32, #tpu.memory_space<vmem>>, %arg4: memref<2x128xf32, #tpu.memory_space<vmem>>) attributes {dimension_semantics = [#tpu.dimension_semantics<parallel>], iteration_bounds = array<i64: 1>, scalar_prefetch = 0 : i64, scratch_operands = 0 : i64, tpu.core_type = #tpu.core_type<tc>, window_params = [{transform_indices = @transform_0, window_bounds = array<i64: 2, 8, 128>}, {pipeline_mode = #tpu.pipeline_mode<synchronous>, transform_indices = @transform_1, window_bounds = array<i64: 1, 128>}, {pipeline_mode = #tpu.pipeline_mode<synchronous>, transform_indices = @transform_2, window_bounds = array<i64: 1, 128>}, {transform_indices = @transform_3, window_bounds = array<i64: 2, 128>}]} {
    %c0 = arith.constant 0 : index
    %c0_0 = arith.constant 0 : index
    %c0_1 = arith.constant 0 : index
    %0 = vector.load %arg1[%c0, %c0_0, %c0_1] : memref<2x8x128xf32, #tpu.memory_space<vmem>>, vector<2x8x128xf32>
    %cst = arith.constant dense<0xFF800000> : vector<2x128xf32>
    %1 = vector.multi_reduction <maximumf>, %0, %cst [1] : vector<2x8x128xf32> to vector<2x128xf32>
    %c0_2 = arith.constant 0 : index
    %c0_3 = arith.constant 0 : index
    %2 = vector.load %arg2[%c0_2, %c0_3] : memref<1x128xf32, #tpu.memory_space<vmem>>, vector<1x128xf32>
    %c0_4 = arith.constant 0 : index
    %c0_5 = arith.constant 0 : index
    %3 = vector.load %arg3[%c0_4, %c0_5] : memref<1x128xf32, #tpu.memory_space<vmem>>, vector<1x128xf32>
    %cst_6 = arith.constant dense<0.000000e+00> : vector<2xf32>
    %4 = vector.multi_reduction <add>, %1, %cst_6 [1] : vector<2x128xf32> to vector<2xf32>
    %5 = vector.shape_cast %4 : vector<2xf32> to vector<2x1xf32>
    %cst_7 = arith.constant 1.280000e+02 : f32
    %6 = vector.broadcast %cst_7 : f32 to vector<2x1xf32>
    %7 = arith.divf %5, %6 : vector<2x1xf32>
    %8 = vector.broadcast %7 : vector<2x1xf32> to vector<2x128xf32>
    %9 = arith.subf %1, %8 : vector<2x128xf32>
    %10 = arith.mulf %9, %9 : vector<2x128xf32>
    %cst_8 = arith.constant dense<0.000000e+00> : vector<2xf32>
    %11 = vector.multi_reduction <add>, %10, %cst_8 [1] : vector<2x128xf32> to vector<2xf32>
    %12 = vector.shape_cast %11 : vector<2xf32> to vector<2x1xf32>
    %cst_9 = arith.constant 1.280000e+02 : f32
    %13 = vector.broadcast %cst_9 : f32 to vector<2x1xf32>
    %14 = arith.divf %12, %13 : vector<2x1xf32>
    %cst_10 = arith.constant 9.99999974E-6 : f32
    %15 = vector.broadcast %cst_10 : f32 to vector<2x1xf32>
    %16 = arith.addf %14, %15 : vector<2x1xf32>
    %17 = math.rsqrt %16 : vector<2x1xf32>
    %18 = vector.broadcast %17 : vector<2x1xf32> to vector<2x128xf32>
    %19 = arith.mulf %9, %18 : vector<2x128xf32>
    %20 = vector.broadcast %2 : vector<1x128xf32> to vector<2x128xf32>
    %21 = arith.mulf %19, %20 : vector<2x128xf32>
    %22 = vector.broadcast %3 : vector<1x128xf32> to vector<2x128xf32>
    %23 = arith.addf %21, %22 : vector<2x128xf32>
    %c0_11 = arith.constant 0 : index
    %c0_12 = arith.constant 0 : index
    %24 = vector.load %arg4[%c0_11, %c0_12] : memref<2x128xf32, #tpu.memory_space<vmem>>, vector<2x128xf32>
    tpu.vector_store %arg4[%c0_11, %c0_12], %23 {strides = array<i32>} : memref<2x128xf32, #tpu.memory_space<vmem>>, vector<2x128xf32>,
    return
  }
  func.func @transform_0(%arg0: i32) -> (i32, i32, i32) {
    %c0_i32 = arith.constant 0 : i32
    %c0_i32_0 = arith.constant 0 : i32
    %c0_i32_1 = arith.constant 0 : i32
    return %arg0, %c0_i32, %c0_i32_0 : i32, i32, i32
  }
  func.func @transform_1(%arg0: i32) -> (i32, i32) {
    %c0_i32 = arith.constant 0 : i32
    %c0_i32_0 = arith.constant 0 : i32
    %c0_i32_1 = arith.constant 0 : i32
    return %c0_i32, %c0_i32_0 : i32, i32
  }
  func.func @transform_2(%arg0: i32) -> (i32, i32) {
    %c0_i32 = arith.constant 0 : i32
    %c0_i32_0 = arith.constant 0 : i32
    %c0_i32_1 = arith.constant 0 : i32
    return %c0_i32, %c0_i32_0 : i32, i32
  }
  func.func @transform_3(%arg0: i32) -> (i32, i32) {
    %c0_i32 = arith.constant 0 : i32
    %c0_i32_0 = arith.constant 0 : i32
    return %arg0, %c0_i32 : i32, i32
  }
}

</mosaic_0001>

<bundles_post_ra>
// kernel: tpu_custom_call.1
= control target key start
LH: loop header
LB: loop body
LE: loop exit
PB: predicated region body
PF: predicated region fallthrough
CT: control target
= control target key end

     0   :  { %8 = vsyncpa [#allocation3], 0  ;;  %s209_s0 = inlined_call_operand.hbm [shape: f32[2,8,128], index: 0, kind: input, shape index: {}]   ;;  %s210_s1 = inlined_call_operand.vmem [shape: f32[1,128], index: 1, kind: input, shape index: {}]   ;;  %s211_s2 = inlined_call_operand.vmem [shape: f32[1,128], index: 2, kind: input, shape index: {}]   ;;  %s212_s3 = inlined_call_operand.hbm [shape: f32[2,128], index: 3, kind: output, shape index: {}]  }
   0x1   :  { %9 = vsyncpa [#allocation4], 0  ;;  %s170_s12 = smov [#allocation2]  }
   0x2   :  { %s15_s13 = sshll.u32 %s170_s12, 4  ;;  %s16_s13 = int_to_ptr.vmem [resolvable:$true] %s15_s13 }
   0x3   :  { %s134_s14 = scalar_lea.vmem %s16_s13, 256  ;;  %p139_p1 = scmp.lt.s32.totalorder %s16_s13, %s16_s13 }
   0x4   :  { %p135_p0 = scmp.ne.s32.totalorder %s16_s13, %s134_s14  ;;  %p140_p2 = scmp.lt.s32.totalorder %s134_s14, %s134_s14 }
   0x6   :  { %p141_p3 = por %p140_p2, %p139_p1 }
   0x8   :  { %p142_p4 = pnand %p141_p3, %p135_p0 }
   0xa   :  { %145 = shalt.err (!%p142_p4)
}
   0xb   :  { %s171_s15 = smov 128   ;;  %s172_s16 = smov 8  }
   0xc   :  { %21 = dma.hbm_to_vmem [thread:$0]  %s209_s0, 256, %s16_s13, [#allocation3], %s171_s15, %s171_s15, %s172_s16  }
   0xd   :  { %166 = dma.done.wait [#allocation3], 256  }
   0xe   :  { %167 = vsyncadd [#allocation3], 4294967040  ;;  %v29_v0 = vld [vmem:[#allocation2] sm:$0xff]  ;;  %v30_v1 = vld [vmem:[#allocation2 + $0x8] sm:$0xff]  ;;  %vm47_vm0 = vcmask 1041409   ;;  %vm50_vm1 = vcmask 1041408  }
   0xf   :  { %v31_v2 = vrot.slane %v29_v0, 4  ;;  %v37_v3 = vrot.slane %v30_v1, 4  ;;  %v118_v32 = vld [vmem:[%s210_s1] ss:$0 sm:$0xff]  ;;  %s173_s22 = smov [#allocation5]  }
  0x10   :  { %v119_v36 = vld [vmem:[%s211_s2] ss:$0 sm:$0xff]  ;;  %s109_s23 = sshll.u32 %s173_s22, 4  ;;  %s110_s23 = int_to_ptr.vmem [resolvable:$true] %s109_s23 }
  0x11   :  { %v32_v4 = vmax.f32 %v29_v0, %v31_v2  ;;  %v38_v5 = vmax.f32 %v30_v1, %v37_v3  ;;  %s146_s24 = scalar_lea.vmem %s110_s23, 32  ;;  %p151_p6 = scmp.lt.s32.totalorder %s110_s23, %s110_s23 }
  0x12   :  { %p147_p5 = scmp.ne.s32.totalorder %s110_s23, %s146_s24  ;;  %p152_p7 = scmp.lt.s32.totalorder %s146_s24, %s146_s24 }
  0x13   :  { %v33_v6 = vrot.slane %v32_v4, 2  ;;  %v39_v7 = vrot.slane %v38_v5, 2 }
  0x14   :  { %p153_p8 = por %p152_p7, %p151_p6 }
  0x15   :  { %v34_v8 = vmax.f32 %v32_v4, %v33_v6  ;;  %v40_v9 = vmax.f32 %v38_v5, %v39_v7 }
  0x16   :  { %p154_p9 = pnand %p153_p8, %p147_p5 }
  0x17   :  { %v35_v10 = vrot.slane %v34_v8, 1  ;;  %v41_v11 = vrot.slane %v40_v9, 1 }
  0x19   :  { %v36_v12 = vmax.f32 %v34_v8, %v35_v10  ;;  %v42_v13 = vmax.f32 %v40_v9, %v41_v11 }
  0x1b   :  { %v48_v14 = vsel %vm47_vm0, %v42_v13, %v36_v12 }
  0x1c   :  { %v51_v15 = vsel %vm50_vm1, %v48_v14, 0.0 }
  0x1d   :  { %52 = vadd.xlane.f32.xlu0 %v51_v15 }
  0xa6   :  { %v53_v16 = vpop.xlane.xlu0 %52 }
  0xa7   :  { %v55_v17 = vmul.f32 0.0078125, %v53_v16 }
  0xa9   :  { %v57_v18 = vrot.slane %v55_v17, 1  ;;  %v60_v19 = vsub.f32 %v36_v12, %v55_v17 }
  0xab   :  { %v61_v20 = vsub.f32 %v42_v13, %v57_v18  ;;  %v62_v22 = vmul.f32 %v60_v19, %v60_v19 }
  0xad   :  { %v63_v21 = vmul.f32 %v61_v20, %v61_v20 }
  0xaf   :  { %v66_v23 = vrot.slane %v63_v21, 7 }
  0xb1   :  { %v67_v24 = vsel %vm47_vm0, %v66_v23, %v62_v22 }
  0xb2   :  { %v69_v25 = vsel %vm50_vm1, %v67_v24, 0.0 }
  0xb3   :  { %70 = vadd.xlane.f32.xlu0 %v69_v25 }
 0x13c   :  { %v71_v26 = vpop.xlane.xlu0 %70 }
 0x13d   :  { %v72_v27 = vmul.f32 0.0078125, %v71_v26 }
 0x13f   :  { %v73_v28 = vadd.f32 1e-05, %v72_v27 }
 0x141   :  { %124 = vrsqrt.f32 %v73_v28 }
 0x14e   :  { %v125_v29 = vpop.eup %124 }
 0x14f   :  { %v76_v30 = vrot.slane %v125_v29, 1  ;;  %v79_v31 = vmul.f32 %v125_v29, %v60_v19 }
 0x151   :  { %v80_v33 = vmul.f32 %v76_v30, %v61_v20  ;;  %v87_v34 = vmul.f32 %v118_v32, %v79_v31 }
 0x153   :  { %v88_v35 = vmul.f32 %v118_v32, %v80_v33  ;;  %v95_v38 = vadd.f32 %v119_v36, %v87_v34 }
 0x155   :  { %v96_v37 = vadd.f32 %v119_v36, %v88_v35 }
 0x157   :  { %v99_v39 = vrot.slane %v96_v37, 7 }
 0x159   :  { %v100_v40 = vsel %vm47_vm0, %v99_v39, %v95_v38 }
 0x15a   :  { %102 = vst [vmem:[#allocation5] sm:$0x3] %v100_v40 }
 0x15b   :  { %157 = shalt.err (!%p154_p9)
}
 0x15c   :  { %112 = dma.vmem_to_hbm [thread:$0]  %s110_s23, 32, %s212_s3, [#allocation4]  }
 0x15d   :  { %168 = dma.done.wait [#allocation4], 32  }
 0x15e   :  { %169 = vsyncadd [#allocation4], 4294967264 }
 0x15f   :  { %116 = vsyncpa [#allocation3], 1 }
 0x160   :  { %117 = vsyncpa [#allocation4], 1 }

</bundles_post_ra>
